<compile_context>
chip_gen: v7x
topology: tpu7x:2x2x1
jax: 0.10.0
libtpu: 0.0.40
codegen_flags: <defaults>
</compile_context>

<pallas_src>
import functools

import numpy as np
import jax
import jax.numpy as jnp
from jax import lax
from jax.experimental import pallas as pl
from jax.experimental.pallas import tpu as pltpu

_TARGET_BLOCK_BYTES = 4 * 1024 * 1024  # ~4 MiB of input per grid step


def _round_up(v, m):
    return ((v + m - 1) // m) * m


def _chip_info():
    """Return (vmem_capacity_bytes, has_two_tensorcores)."""
    kind = ""
    try:
        kind = jax.devices()[0].device_kind.lower()
    except Exception:
        pass
    vmem = None
    try:
        vmem = int(pltpu.get_tpu_info().vmem_capacity_bytes)
    except Exception:
        vmem = None
    if vmem is None:
        # Infer from device kind instead of a blanket 64 MiB default:
        # v7x has 64 MiB / TC, v5e/v6e have 128 MiB.
        vmem = 64 * 1024 * 1024 if "v7" in kind else 128 * 1024 * 1024
    multicore = "v7" in kind  # v7x: 2 TensorCores per chip; v5e/v6e: 1
    return vmem, multicore


# ----------------------------------------------------------------------------
# Fast path: the whole reduction axis (N) is resident in every block.
# ----------------------------------------------------------------------------
def _softmax_resident_kernel(x_ref, o_ref):
    x = x_ref[...].astype(jnp.float32)
    x_max = jnp.max(x, axis=0, keepdims=True)          # max over dim 0 (XLU)
    x_exp = jnp.exp(x - x_max)                          # stable exp (EUP)
    sum_exp = jnp.sum(x_exp, axis=0, keepdims=True)     # sum over dim 0
    # Exact reciprocal on (1, tile_d) + VPU multiply instead of a broadcast
    # divide over (N, tile_d); stays within 1e-6 of the reference.
    inv = pl.reciprocal(sum_exp, approx=False)
    o_ref[...] = (x_exp * inv).astype(o_ref.dtype)


def _softmax_resident(x2, out_dtype, tile_d, vmem_limit, io_bytes):
    N, D = x2.shape
    d_blocks = -(-D // tile_d)  # ragged last block handled by Pallas masking
    return pl.pallas_call(
        _softmax_resident_kernel,
        out_shape=jax.ShapeDtypeStruct((N, D), out_dtype),
        grid_spec=pltpu.PrefetchScalarGridSpec(
            num_scalar_prefetch=0,
            grid=(d_blocks,),
            in_specs=[pl.BlockSpec((N, tile_d), lambda j: (0, j))],
            out_specs=pl.BlockSpec((N, tile_d), lambda j: (0, j)),
        ),
        compiler_params=pltpu.CompilerParams(
            dimension_semantics=("parallel",),
            vmem_limit_bytes=vmem_limit,
        ),
        cost_estimate=pl.CostEstimate(
            flops=4 * N * D,
            transcendentals=N * D,
            bytes_accessed=2 * N * D * io_bytes,
        ),
    )(x2)


# ----------------------------------------------------------------------------
# Tall path: N does not fit in VMEM -> two-pass softmax with a reduction grid
# axis over N ("arbitrary"), online running max / rescaled sum accumulated in
# resident (1, tile_d) output blocks.
# ----------------------------------------------------------------------------
def _softmax_stats_kernel(x_ref, m_ref, l_ref, *, n_rows, block_rows):
    nk = pl.program_id(1)

    @pl.when(nk == 0)
    def _():
        m_ref[...] = jnp.full_like(m_ref, -jnp.inf)
        l_ref[...] = jnp.zeros_like(l_ref)

    x = x_ref[...].astype(jnp.float32)
    row = nk * block_rows + lax.broadcasted_iota(jnp.int32, x.shape, 0)
    valid = row < n_rows                               # mask ragged last N block

    x_masked = jnp.where(valid, x, -jnp.inf)
    m_prev = m_ref[...]
    m_new = jnp.maximum(m_prev, jnp.max(x_masked, axis=0, keepdims=True))

    scale = jnp.exp(m_prev - m_new)                    # rescale previous sum
    e = jnp.where(valid, jnp.exp(x - m_new), 0.0)
    l_ref[...] = l_ref[...] * scale + jnp.sum(e, axis=0, keepdims=True)
    m_ref[...] = m_new


def _softmax_apply_kernel(x_ref, m_ref, l_ref, o_ref):
    x = x_ref[...].astype(jnp.float32)
    inv = pl.reciprocal(l_ref[...], approx=False)
    o_ref[...] = (jnp.exp(x - m_ref[...]) * inv).astype(o_ref.dtype)


def _softmax_two_pass(x2, out_dtype, tn, tile_d, vmem_limit, io_bytes=4):
    N, D = x2.shape
    n_blocks = -(-N // tn)
    d_blocks = -(-D // tile_d)

    stats_kernel = functools.partial(
        _softmax_stats_kernel, n_rows=N, block_rows=tn)

    m, l = pl.pallas_call(
        stats_kernel,
        out_shape=(jax.ShapeDtypeStruct((1, D), jnp.float32),
                   jax.ShapeDtypeStruct((1, D), jnp.float32)),
        grid_spec=pltpu.PrefetchScalarGridSpec(
            num_scalar_prefetch=0,
            grid=(d_blocks, n_blocks),
            in_specs=[pl.BlockSpec((tn, tile_d), lambda dj, nk: (nk, dj))],
            out_specs=[pl.BlockSpec((1, tile_d), lambda dj, nk: (0, dj)),
                       pl.BlockSpec((1, tile_d), lambda dj, nk: (0, dj))],
        ),
        compiler_params=pltpu.CompilerParams(
            dimension_semantics=("parallel", "arbitrary"),
            vmem_limit_bytes=vmem_limit,
        ),
        cost_estimate=pl.CostEstimate(
            flops=4 * N * D,
            transcendentals=N * D,
            bytes_accessed=N * D * io_bytes + 8 * D,
        ),
    )(x2)

    return pl.pallas_call(
        _softmax_apply_kernel,
        out_shape=jax.ShapeDtypeStruct((N, D), out_dtype),
        grid_spec=pltpu.PrefetchScalarGridSpec(
            num_scalar_prefetch=0,
            grid=(d_blocks, n_blocks),
            in_specs=[pl.BlockSpec((tn, tile_d), lambda dj, nk: (nk, dj)),
                      pl.BlockSpec((1, tile_d), lambda dj, nk: (0, dj)),
                      pl.BlockSpec((1, tile_d), lambda dj, nk: (0, dj))],
            out_specs=pl.BlockSpec((tn, tile_d), lambda dj, nk: (nk, dj)),
        ),
        compiler_params=pltpu.CompilerParams(
            dimension_semantics=("parallel", "parallel"),
            vmem_limit_bytes=vmem_limit,
        ),
        cost_estimate=pl.CostEstimate(
            flops=2 * N * D,
            transcendentals=N * D,
            bytes_accessed=2 * N * D * io_bytes + 8 * D,
        ),
    )(x2, m, l)


# ----------------------------------------------------------------------------
# Public wrapper.
# ----------------------------------------------------------------------------
def my_softmax_stable(x):
    """Stable softmax over axis 0, any rank >= 1, via Pallas TPU kernels."""
    orig_shape = x.shape
    orig_dtype = x.dtype
    N = int(orig_shape[0])
    D = int(np.prod(orig_shape[1:])) if len(orig_shape) > 1 else 1
    x2 = x.reshape(N, D)

    io_bytes = jnp.dtype(orig_dtype).itemsize
    vmem_cap, multicore = _chip_info()
    vmem_limit = int(vmem_cap * 3 // 4)   # 96 MiB on v5e/v6e, 48 MiB on v7x
    tile_budget = vmem_cap // 2           # per-grid-step working-set budget

    # Per-element VMEM cost: double-buffered input + output in the I/O dtype
    # plus ~3 f32 temporaries inside the kernel.
    per_elem = 4 * io_bytes + 12
    per_lane = N * per_elem               # one lane with the full N resident
    d_pad128 = _round_up(D, 128)

    if 128 * per_lane <= tile_budget:
        # Fast path: whole reduction axis resident; tile D by bytes.
        max_lanes = max(128, (tile_budget // per_lane) // 128 * 128)
        target_lanes = max(
            128, (_TARGET_BLOCK_BYTES // max(N * io_bytes, 1)) // 128 * 128)
        tile_d = int(min(max_lanes, target_lanes, d_pad128))

        if tile_d >= d_pad128:
            # Whole array fits in a single block.
            if multicore and D >= 256:
                # v7x megacore: 2-step cdiv grid (no wrapper padding; Pallas
                # masks the ragged last block) so both TensorCores get work.
                tile_d = _round_up(-(-D // 2), 128)
            else:
                # Single-TC v5e/v6e: one full-width, lane-exact block.
                tile_d = D
        out2 = _softmax_resident(x2, orig_dtype, tile_d, vmem_limit, io_bytes)
    else:
        # Tall path: reduction axis too large for VMEM even at 128 lanes.
        tile_d = min(512, d_pad128)
        if tile_d >= D:
            tile_d = D                    # lane-exact full-width block
        tn = (tile_budget // max(tile_d * per_elem, 1)) // 8 * 8
        tn = int(max(8, min(tn, _round_up(N, 8))))
        out2 = _softmax_two_pass(x2, orig_dtype, tn, tile_d, vmem_limit,
                                 io_bytes)

    return out2.reshape(orig_shape)


if __name__ == "__main__":
    key = jax.random.PRNGKey(0)
    # Small shape consistent with the module: softmax over dim 0 of (seq=8, hidden=32)
    x = jax.random.normal(key, (8, 32), dtype=jnp.float32)

    out = jax.block_until_ready(my_softmax_stable(x))

    # Reference (plain JAX) for sanity check.
    x_max = jnp.max(x, axis=0, keepdims=True)
    x_exp = jnp.exp(x - x_max)
    ref = x_exp / jnp.sum(x_exp, axis=0, keepdims=True)

    assert out.shape == x.shape and out.dtype == x.dtype
    np.testing.assert_allclose(np.asarray(out), np.asarray(ref),
                               rtol=1e-6, atol=1e-6)

    # Also exercise the N-tiled two-pass path (used when the reduction axis
    # does not fit in VMEM) at a deliberately tiny forced tiling, including
    # ragged last blocks along both N (44 % 16 != 0) and D (160 % 128 != 0).
    x_tall = jax.random.normal(jax.random.PRNGKey(1), (44, 160),
                               dtype=jnp.float32)
    out_tall = jax.block_until_ready(
        _softmax_two_pass(x_tall, jnp.float32, tn=16, tile_d=128,
                          vmem_limit=64 * 1024 * 1024, io_bytes=4))
    m_t = jnp.max(x_tall, axis=0, keepdims=True)
    e_t = jnp.exp(x_tall - m_t)
    ref_tall = e_t / jnp.sum(e_t, axis=0, keepdims=True)
    np.testing.assert_allclose(np.asarray(out_tall), np.asarray(ref_tall),
                               rtol=1e-5, atol=1e-5)

    print("KERNEL_OK")
</pallas_src>

<mosaic_0001>
module attributes {stable_mosaic.version = 11 : i64} {
  func.func @_softmax_resident_kernel(%arg0: i32, %arg1: memref<8x32xf32, #tpu.memory_space<vmem>>, %arg2: memref<8x32xf32, #tpu.memory_space<vmem>>) attributes {dimension_semantics = [#tpu.dimension_semantics<parallel>], iteration_bounds = array<i64: 1>, scalar_prefetch = 0 : i64, scratch_operands = 0 : i64, tpu.core_type = #tpu.core_type<tc>, window_params = [{transform_indices = @transform_0, window_bounds = array<i64: 8, 32>}, {transform_indices = @transform_1, window_bounds = array<i64: 8, 32>}]} {
    %c0 = arith.constant 0 : index
    %c0_0 = arith.constant 0 : index
    %0 = vector.load %arg1[%c0, %c0_0] : memref<8x32xf32, #tpu.memory_space<vmem>>, vector<8x32xf32>
    %cst = arith.constant dense<0xFF800000> : vector<32xf32>
    %1 = vector.multi_reduction <maximumf>, %0, %cst [0] : vector<8x32xf32> to vector<32xf32>
    %2 = vector.shape_cast %1 : vector<32xf32> to vector<1x32xf32>
    %3 = vector.broadcast %2 : vector<1x32xf32> to vector<8x32xf32>
    %4 = arith.subf %0, %3 : vector<8x32xf32>
    %5 = math.exp %4 : vector<8x32xf32>
    %cst_1 = arith.constant dense<0.000000e+00> : vector<32xf32>
    %6 = vector.multi_reduction <add>, %5, %cst_1 [0] : vector<8x32xf32> to vector<32xf32>
    %7 = vector.shape_cast %6 : vector<32xf32> to vector<1x32xf32>
    %8 = tpu.reciprocal %7 : vector<1x32xf32> -> vector<1x32xf32>
    %9 = vector.broadcast %8 : vector<1x32xf32> to vector<8x32xf32>
    %10 = arith.mulf %5, %9 : vector<8x32xf32>
    %c0_2 = arith.constant 0 : index
    %c0_3 = arith.constant 0 : index
    %11 = vector.load %arg2[%c0_2, %c0_3] : memref<8x32xf32, #tpu.memory_space<vmem>>, vector<8x32xf32>
    tpu.vector_store %arg2[%c0_2, %c0_3], %10 {strides = array<i32>} : memref<8x32xf32, #tpu.memory_space<vmem>>, vector<8x32xf32>,
    return
  }
  func.func @transform_0(%arg0: i32) -> (i32, i32) {
    %c0_i32 = arith.constant 0 : i32
    %c0_i32_0 = arith.constant 0 : i32
    return %c0_i32, %arg0 : i32, i32
  }
  func.func @transform_1(%arg0: i32) -> (i32, i32) {
    %c0_i32 = arith.constant 0 : i32
    %c0_i32_0 = arith.constant 0 : i32
    return %c0_i32, %arg0 : i32, i32
  }
}

</mosaic_0001>

<bundles_post_ra>
// kernel: tpu_custom_call.1
= control target key start
LH: loop header
LB: loop body
LE: loop exit
PB: predicated region body
PF: predicated region fallthrough
CT: control target
= control target key end

     0   :  { %6 = vsyncpa [#allocation3], 0  ;;  %s151_s0 = inlined_call_operand.hbm [shape: f32[8,32], index: 0, kind: input, shape index: {}]   ;;  %s152_s1 = inlined_call_operand.hbm [shape: f32[8,32], index: 1, kind: output, shape index: {}]  }
   0x1   :  { %7 = vsyncpa [#allocation4], 0  ;;  %s112_s6 = smov [#allocation2]   ;;  %s64_s10 = scalar_lea.hbm %s151_s0, 128 }
   0x2   :  { %s14_s7 = sshll.u32 %s112_s6, 4  ;;  %p65_p0 = scmp.ne.s32.totalorder %s151_s0, %s64_s10  ;;  %s15_s7 = int_to_ptr.vmem [resolvable:$true] %s14_s7 }
   0x3   :  { %p68_p1 = scmp.lt.u32.totalorder %s64_s10, %s151_s0 }
   0x5   :  { %p70_p2 = pnand %p68_p1, %p65_p0 }
   0x7   :  { %73 = shalt.err (!%p70_p2)
}
   0x8   :  { %s74_s15 = scalar_lea.vmem %s15_s7, 128  ;;  %p79_p4 = scmp.lt.s32.totalorder %s15_s7, %s15_s7 }
   0x9   :  { %p75_p3 = scmp.ne.s32.totalorder %s15_s7, %s74_s15  ;;  %p80_p5 = scmp.lt.s32.totalorder %s74_s15, %s74_s15 }
   0xb   :  { %p81_p6 = por %p80_p5, %p79_p4 }
   0xd   :  { %p82_p7 = pnand %p81_p6, %p75_p3 }
   0xf   :  { %85 = shalt.err (!%p82_p7)
}
  0x10   :  { %17 = dma.hbm_to_vmem [thread:$0]  %s151_s0, 128, %s15_s7, [#allocation3]  }
  0x11   :  { %108 = dma.done.wait [#allocation3], 128  }
  0x12   :  { %109 = vsyncadd [#allocation3], 4294967168  ;;  %vm22_vm0 = vcmask 261120   ;;  %v21_v0 = vld [vmem:[#allocation2] sm:$0xff]  ;;  %s113_s0 = smov [#allocation5]  }
  0x13   :  { %v23_v1 = vsel %vm22_vm0, %v21_v0, -inf  ;;  %s49_s18 = sshll.u32 %s113_s0, 4  ;;  %s50_s18 = int_to_ptr.vmem [resolvable:$true] %s49_s18 }
  0x14   :  { %v24_v2 = vrot.slane %v23_v1, 4  ;;  %s86_s19 = scalar_lea.vmem %s50_s18, 128  ;;  %p91_p9 = scmp.lt.s32.totalorder %s50_s18, %s50_s18 }
  0x15   :  { %p87_p8 = scmp.ne.s32.totalorder %s50_s18, %s86_s19  ;;  %p92_p10 = scmp.lt.s32.totalorder %s86_s19, %s86_s19 }
  0x16   :  { %v25_v3 = vmax.f32 %v23_v1, %v24_v2 }
  0x17   :  { %p93_p11 = por %p92_p10, %p91_p9 }
  0x18   :  { %v26_v4 = vrot.slane %v25_v3, 2 }
  0x19   :  { %p94_p12 = pnand %p93_p11, %p87_p8 }
  0x1a   :  { %v27_v5 = vmax.f32 %v25_v3, %v26_v4 }
  0x1c   :  { %v28_v6 = vrot.slane %v27_v5, 1 }
  0x1e   :  { %v29_v7 = vmax.f32 %v27_v5, %v28_v6 }
  0x20   :  { %v30_v8 = vsub.f32 %v21_v0, %v29_v7 }
  0x22   :  { %v31_v9 = vmul.f32 1.442695, %v30_v8 }
  0x24   :  { %60 = vpow2.f32 %v31_v9 }
  0x2e   :  { %v61_v10 = vpop.eup %60 }
  0x2f   :  { %v33_v11 = vsel %vm22_vm0, %v61_v10, 0.0 }
  0x30   :  { %v34_v12 = vrot.slane %v33_v11, 4 }
  0x32   :  { %v35_v13 = vadd.f32 %v34_v12, %v33_v11 }
  0x34   :  { %v36_v14 = vrot.slane %v35_v13, 2 }
  0x36   :  { %v37_v15 = vadd.f32 %v36_v14, %v35_v13 }
  0x38   :  { %v38_v16 = vrot.slane %v37_v15, 1 }
  0x3a   :  { %v39_v17 = vadd.f32 %v38_v16, %v37_v15 }
  0x3c   :  { %62 = vrcp.f32 %v39_v17 }
  0x46   :  { %v63_v18 = vpop.eup %62 }
  0x47   :  { %v41_v19 = vmul.f32 %v63_v18, %v61_v10 }
  0x49   :  { %42 = vst.msk [vmem:[#allocation5] sm:$0xff] %vm22_vm0, %v41_v19 }
  0x4a   :  { %97 = shalt.err (!%p94_p12)
}
  0x4b   :  { %s98_s22 = scalar_lea.hbm %s152_s1, 128 }
  0x4c   :  { %p99_p13 = scmp.ne.s32.totalorder %s152_s1, %s98_s22  ;;  %p102_p0 = scmp.lt.u32.totalorder %s98_s22, %s152_s1 }
  0x4e   :  { %p104_p1 = pnand %p102_p0, %p99_p13 }
  0x50   :  { %107 = shalt.err (!%p104_p1)
}
  0x51   :  { %52 = dma.vmem_to_hbm [thread:$0]  %s50_s18, 128, %s152_s1, [#allocation4]  }
  0x52   :  { %110 = dma.done.wait [#allocation4], 128  }
  0x53   :  { %111 = vsyncadd [#allocation4], 4294967168 }
  0x54   :  { %56 = vsyncpa [#allocation3], 1 }
  0x55   :  { %57 = vsyncpa [#allocation4], 1 }

</bundles_post_ra>
